<compile_context>
chip_gen: v7x
topology: tpu7x:2x2x1
jax: 0.10.0
libtpu: 0.0.40
codegen_flags: <defaults>
</compile_context>

<pallas_src>
import functools

import jax
import jax.numpy as jnp
from jax import lax
from jax.experimental import pallas as pl
from jax.experimental.pallas import tpu as pltpu


# ---------------------------------------------------------------------------
# Fused kernel: head-batched projections + attention + output projection
# for a block of batch elements, entirely in VMEM.
# ---------------------------------------------------------------------------
def mha_fused_kernel(q_ref, k_ref, v_ref,
                     wq_ref, bq_ref, wk_ref, wv_ref, bv_ref,
                     wo_ref, bo_ref, o_ref,
                     *, num_heads, dim_q, dim_k):
    Bt, Sq, Din = q_ref.shape
    Sk = k_ref.shape[1]

    # Flatten the batch block into the row (sublane) axis -> one big matmul each.
    q2 = q_ref[...].reshape(Bt * Sq, Din)
    k2 = k_ref[...].reshape(Bt * Sk, Din)
    v2 = v_ref[...].reshape(Bt * Sk, Din)

    # Lane-dense, head-batched projections (the 1/sqrt(dim_q) scale is folded
    # into wq/bq at trace time; bk cancels in the softmax and is dropped).
    Q = jnp.dot(q2, wq_ref[...], preferred_element_type=jnp.float32) + bq_ref[...]
    K = jnp.dot(k2, wk_ref[...], preferred_element_type=jnp.float32)
    V = jnp.dot(v2, wv_ref[...], preferred_element_type=jnp.float32) + bv_ref[...]

    wo = wo_ref[...]           # (H*Dk, Din), resident
    bo = bo_ref[...]           # (1, Din)

    # Attention per batch element / head (Bt and H are small, static -> unrolled).
    # TODO(synk): for realistic S, replace with flash-style Sk tiling + fori_loop.
    for b in range(Bt):
        Qb = Q[b * Sq:(b + 1) * Sq, :]
        Kb = K[b * Sk:(b + 1) * Sk, :]
        Vb = V[b * Sk:(b + 1) * Sk, :]

        head_outs = []
        for h in range(num_heads):
            Qh = Qb[:, h * dim_q:(h + 1) * dim_q]          # (Sq, Dq)
            Kh = Kb[:, h * dim_k:(h + 1) * dim_k]          # (Sk, Dk)
            Vh = Vb[:, h * dim_k:(h + 1) * dim_k]          # (Sk, Dk)

            # scores = Qh @ Kh^T without materializing a transpose of K.
            scores = lax.dot_general(
                Qh, Kh, dimension_numbers=(((1,), (1,)), ((), ())),
                preferred_element_type=jnp.float32)        # (Sq, Sk)

            # numerically-stable softmax over the key axis
            m = jnp.max(scores, axis=-1, keepdims=True)
            e = jnp.exp(scores - m)
            probs = e * pl.reciprocal(jnp.sum(e, axis=-1, keepdims=True),
                                      approx=True)

            head_outs.append(
                jnp.dot(probs, Vh, preferred_element_type=jnp.float32))

        # concat(heads) @ Wo : single matmul, contraction dim = H*Dk.
        concat = jnp.concatenate(head_outs, axis=-1)        # (Sq, H*Dk)
        out_b = jnp.dot(concat, wo, preferred_element_type=jnp.float32) + bo
        o_ref[b] = out_b.astype(o_ref.dtype)


# ---------------------------------------------------------------------------
# Wrapper
# ---------------------------------------------------------------------------
def multi_head_attention(query, key, value, params, batch_block=None):
    """query: (B, Sq, Din), key/value: (B, Sk, Din). Returns (B, Sq, Din)."""
    Wq, bq, Wk, bk, Wv, bv, Wo, bo = params
    del bk  # cancels inside the softmax (shift along the key axis)

    B, Sq, Din = query.shape
    Sk = key.shape[1]
    H, _, Dq = Wq.shape
    Dk = Wk.shape[-1]

    # Process as much batch per grid step as is reasonable (per-step overhead is
    # ~0.35 us; toy shapes collapse to grid=(1,)).  Keep it a parameter so large
    # problems can shard the batch axis across TCs (v7x megacore).
    if batch_block is None:
        batch_block = B if B * max(Sq, Sk) <= 2048 else 1
    assert B % batch_block == 0, "batch_block must divide B"

    # Fold the 1/sqrt(dim_q) attention scale into the query projection and build
    # head-batched, lane-dense weight layouts (once, at trace time).
    inv_scale = 1.0 / (float(Dq) ** 0.5)
    Wq_all = (Wq * inv_scale).transpose(1, 0, 2).reshape(Din, H * Dq)
    bq_all = (bq * inv_scale).reshape(1, H * Dq)
    Wk_all = Wk.transpose(1, 0, 2).reshape(Din, H * Dk)
    Wv_all = Wv.transpose(1, 0, 2).reshape(Din, H * Dk)
    bv_all = bv.reshape(1, H * Dk)
    # Wo stays (H*Dk, Din): rows are already head-major, matching the concat.

    kernel = functools.partial(mha_fused_kernel,
                               num_heads=H, dim_q=Dq, dim_k=Dk)

    const2 = lambda b: (0, 0)     # constant index_map -> weights stay resident

    return pl.pallas_call(
        kernel,
        out_shape=jax.ShapeDtypeStruct((B, Sq, Din), query.dtype),
        grid_spec=pltpu.PrefetchScalarGridSpec(
            num_scalar_prefetch=0,
            grid=(B // batch_block,),
            in_specs=[
                pl.BlockSpec((batch_block, Sq, Din), lambda b: (b, 0, 0)),  # query
                pl.BlockSpec((batch_block, Sk, Din), lambda b: (b, 0, 0)),  # key
                pl.BlockSpec((batch_block, Sk, Din), lambda b: (b, 0, 0)),  # value
                pl.BlockSpec((Din, H * Dq), const2),   # Wq (scaled, head-batched)
                pl.BlockSpec((1, H * Dq),   const2),   # bq (scaled)
                pl.BlockSpec((Din, H * Dk), const2),   # Wk (head-batched)
                pl.BlockSpec((Din, H * Dk), const2),   # Wv (head-batched)
                pl.BlockSpec((1, H * Dk),   const2),   # bv
                pl.BlockSpec((H * Dk, Din), const2),   # Wo
                pl.BlockSpec((1, Din),      const2),   # bo
            ],
            out_specs=pl.BlockSpec((batch_block, Sq, Din), lambda b: (b, 0, 0)),
        ),
        compiler_params=pltpu.CompilerParams(
            dimension_semantics=("parallel",)),   # shards batch blocks across TCs
        # NOTE: at realistic sizes also raise vmem_limit_bytes here and mark the
        # resident weight specs pipeline_mode=pl.Buffered(1) (see TODO above).
    )(query, key, value, Wq_all, bq_all, Wk_all, Wv_all, bv_all, Wo, bo)


# ---------------------------------------------------------------------------
# Pure-JAX reference (mirrors the PyTorch forward) for a sanity check
# ---------------------------------------------------------------------------
def reference_mha(query, key, value, params):
    Wq, bq, Wk, bk, Wv, bv, Wo, bo = params
    heads = []
    H = Wq.shape[0]
    for h in range(H):
        Q = query @ Wq[h] + bq[h]
        K = key @ Wk[h] + bk[h]
        V = value @ Wv[h] + bv[h]
        scores = jnp.einsum("bqd,bkd->bqk", Q, K) / (Q.shape[-1] ** 0.5)
        probs = jax.nn.softmax(scores, axis=-1)
        heads.append(jnp.einsum("bqk,bkd->bqd", probs, V))
    concat = jnp.concatenate(heads, axis=-1)
    return concat @ Wo + bo


def make_params(key, num_heads, dim_in, dim_q, dim_k):
    ks = jax.random.split(key, 8)
    scale = 0.1
    Wq = scale * jax.random.normal(ks[0], (num_heads, dim_in, dim_q), jnp.float32)
    bq = scale * jax.random.normal(ks[1], (num_heads, 1, dim_q), jnp.float32)
    Wk = scale * jax.random.normal(ks[2], (num_heads, dim_in, dim_k), jnp.float32)
    bk = scale * jax.random.normal(ks[3], (num_heads, 1, dim_k), jnp.float32)
    Wv = scale * jax.random.normal(ks[4], (num_heads, dim_in, dim_k), jnp.float32)
    bv = scale * jax.random.normal(ks[5], (num_heads, 1, dim_k), jnp.float32)
    Wo = scale * jax.random.normal(ks[6], (num_heads * dim_k, dim_in), jnp.float32)
    bo = scale * jax.random.normal(ks[7], (1, dim_in), jnp.float32)
    return (Wq, bq, Wk, bk, Wv, bv, Wo, bo)


if __name__ == "__main__":
    # Small shapes: batch=2, seq=8, dim_in=32, num_heads=4, dim_q=dim_k=16
    # (the reference bmm(Q, K^T) requires dim_q == dim_k).
    B, S, DIM_IN = 2, 8, 32
    NUM_HEADS, DIM_Q, DIM_K = 4, 16, 16

    root = jax.random.PRNGKey(0)
    kq, kk, kv, kp = jax.random.split(root, 4)
    query = jax.random.normal(kq, (B, S, DIM_IN), jnp.float32)
    key_t = jax.random.normal(kk, (B, S, DIM_IN), jnp.float32)
    value = jax.random.normal(kv, (B, S, DIM_IN), jnp.float32)
    params = make_params(kp, NUM_HEADS, DIM_IN, DIM_Q, DIM_K)

    out = multi_head_attention(query, key_t, value, params)
    out = jax.block_until_ready(out)

    ref = reference_mha(query, key_t, value, params)
    assert out.shape == (B, S, DIM_IN)
    # tolerance loosened vs exact math because of the approx (EUP) reciprocal
    assert jnp.allclose(out, ref, atol=1e-2, rtol=1e-2), "mismatch vs reference"

    print("KERNEL_OK")
</pallas_src>

<mosaic_0001>
module attributes {stable_mosaic.version = 11 : i64} {
  func.func @mha_fused_kernel(%arg0: i32, %arg1: memref<2x8x32xf32, #tpu.memory_space<vmem>>, %arg2: memref<2x8x32xf32, #tpu.memory_space<vmem>>, %arg3: memref<2x8x32xf32, #tpu.memory_space<vmem>>, %arg4: memref<32x64xf32, #tpu.memory_space<vmem>>, %arg5: memref<1x64xf32, #tpu.memory_space<vmem>>, %arg6: memref<32x64xf32, #tpu.memory_space<vmem>>, %arg7: memref<32x64xf32, #tpu.memory_space<vmem>>, %arg8: memref<1x64xf32, #tpu.memory_space<vmem>>, %arg9: memref<64x32xf32, #tpu.memory_space<vmem>>, %arg10: memref<1x32xf32, #tpu.memory_space<vmem>>, %arg11: memref<2x8x32xf32, #tpu.memory_space<vmem>>) attributes {dimension_semantics = [#tpu.dimension_semantics<parallel>], iteration_bounds = array<i64: 1>, scalar_prefetch = 0 : i64, scratch_operands = 0 : i64, tpu.core_type = #tpu.core_type<tc>, window_params = [{transform_indices = @transform_0, window_bounds = array<i64: 2, 8, 32>}, {transform_indices = @transform_1, window_bounds = array<i64: 2, 8, 32>}, {transform_indices = @transform_2, window_bounds = array<i64: 2, 8, 32>}, {pipeline_mode = #tpu.pipeline_mode<synchronous>, transform_indices = @transform_3, window_bounds = array<i64: 32, 64>}, {pipeline_mode = #tpu.pipeline_mode<synchronous>, transform_indices = @transform_4, window_bounds = array<i64: 1, 64>}, {pipeline_mode = #tpu.pipeline_mode<synchronous>, transform_indices = @transform_5, window_bounds = array<i64: 32, 64>}, {pipeline_mode = #tpu.pipeline_mode<synchronous>, transform_indices = @transform_6, window_bounds = array<i64: 32, 64>}, {pipeline_mode = #tpu.pipeline_mode<synchronous>, transform_indices = @transform_7, window_bounds = array<i64: 1, 64>}, {pipeline_mode = #tpu.pipeline_mode<synchronous>, transform_indices = @transform_8, window_bounds = array<i64: 64, 32>}, {pipeline_mode = #tpu.pipeline_mode<synchronous>, transform_indices = @transform_9, window_bounds = array<i64: 1, 32>}, {transform_indices = @transform_10, window_bounds = array<i64: 2, 8, 32>}]} {
    %c0 = arith.constant 0 : index
    %c0_0 = arith.constant 0 : index
    %c0_1 = arith.constant 0 : index
    %0 = vector.load %arg1[%c0, %c0_0, %c0_1] : memref<2x8x32xf32, #tpu.memory_space<vmem>>, vector<2x8x32xf32>
    %1 = vector.shape_cast %0 : vector<2x8x32xf32> to vector<16x32xf32>
    %c0_2 = arith.constant 0 : index
    %c0_3 = arith.constant 0 : index
    %c0_4 = arith.constant 0 : index
    %2 = vector.load %arg2[%c0_2, %c0_3, %c0_4] : memref<2x8x32xf32, #tpu.memory_space<vmem>>, vector<2x8x32xf32>
    %3 = vector.shape_cast %2 : vector<2x8x32xf32> to vector<16x32xf32>
    %c0_5 = arith.constant 0 : index
    %c0_6 = arith.constant 0 : index
    %c0_7 = arith.constant 0 : index
    %4 = vector.load %arg3[%c0_5, %c0_6, %c0_7] : memref<2x8x32xf32, #tpu.memory_space<vmem>>, vector<2x8x32xf32>
    %5 = vector.shape_cast %4 : vector<2x8x32xf32> to vector<16x32xf32>
    %c0_8 = arith.constant 0 : index
    %c0_9 = arith.constant 0 : index
    %6 = vector.load %arg4[%c0_8, %c0_9] : memref<32x64xf32, #tpu.memory_space<vmem>>, vector<32x64xf32>
    %cst = arith.constant dense<0.000000e+00> : vector<16x64xf32>
    %7 = tpu.matmul %1, %6, %cst {dimension_numbers = #tpu.dot_dimension_numbers<[1], [0], [0], [1], [0, 0, 1, 1], [], []>} : vector<16x32xf32>, vector<32x64xf32>, vector<16x64xf32> -> vector<16x64xf32>
    %c0_10 = arith.constant 0 : index
    %c0_11 = arith.constant 0 : index
    %8 = vector.load %arg5[%c0_10, %c0_11] : memref<1x64xf32, #tpu.memory_space<vmem>>, vector<1x64xf32>
    %9 = vector.broadcast %8 : vector<1x64xf32> to vector<16x64xf32>
    %10 = arith.addf %7, %9 : vector<16x64xf32>
    %c0_12 = arith.constant 0 : index
    %c0_13 = arith.constant 0 : index
    %11 = vector.load %arg6[%c0_12, %c0_13] : memref<32x64xf32, #tpu.memory_space<vmem>>, vector<32x64xf32>
    %cst_14 = arith.constant dense<0.000000e+00> : vector<16x64xf32>
    %12 = tpu.matmul %3, %11, %cst_14 {dimension_numbers = #tpu.dot_dimension_numbers<[1], [0], [0], [1], [0, 0, 1, 1], [], []>} : vector<16x32xf32>, vector<32x64xf32>, vector<16x64xf32> -> vector<16x64xf32>
    %c0_15 = arith.constant 0 : index
    %c0_16 = arith.constant 0 : index
    %13 = vector.load %arg7[%c0_15, %c0_16] : memref<32x64xf32, #tpu.memory_space<vmem>>, vector<32x64xf32>
    %cst_17 = arith.constant dense<0.000000e+00> : vector<16x64xf32>
    %14 = tpu.matmul %5, %13, %cst_17 {dimension_numbers = #tpu.dot_dimension_numbers<[1], [0], [0], [1], [0, 0, 1, 1], [], []>} : vector<16x32xf32>, vector<32x64xf32>, vector<16x64xf32> -> vector<16x64xf32>
    %c0_18 = arith.constant 0 : index
    %c0_19 = arith.constant 0 : index
    %15 = vector.load %arg8[%c0_18, %c0_19] : memref<1x64xf32, #tpu.memory_space<vmem>>, vector<1x64xf32>
    %16 = vector.broadcast %15 : vector<1x64xf32> to vector<16x64xf32>
    %17 = arith.addf %14, %16 : vector<16x64xf32>
    %c0_20 = arith.constant 0 : index
    %c0_21 = arith.constant 0 : index
    %18 = vector.load %arg9[%c0_20, %c0_21] : memref<64x32xf32, #tpu.memory_space<vmem>>, vector<64x32xf32>
    %c0_22 = arith.constant 0 : index
    %c0_23 = arith.constant 0 : index
    %19 = vector.load %arg10[%c0_22, %c0_23] : memref<1x32xf32, #tpu.memory_space<vmem>>, vector<1x32xf32>
    %20 = vector.extract_strided_slice %10 {offsets = [0, 0], sizes = [8, 64], strides = [1, 1]} : vector<16x64xf32> to vector<8x64xf32>
    %21 = vector.extract_strided_slice %12 {offsets = [0, 0], sizes = [8, 64], strides = [1, 1]} : vector<16x64xf32> to vector<8x64xf32>
    %22 = vector.extract_strided_slice %17 {offsets = [0, 0], sizes = [8, 64], strides = [1, 1]} : vector<16x64xf32> to vector<8x64xf32>
    %23 = vector.extract_strided_slice %20 {offsets = [0, 0], sizes = [8, 16], strides = [1, 1]} : vector<8x64xf32> to vector<8x16xf32>
    %24 = vector.extract_strided_slice %21 {offsets = [0, 0], sizes = [8, 16], strides = [1, 1]} : vector<8x64xf32> to vector<8x16xf32>
    %25 = vector.extract_strided_slice %22 {offsets = [0, 0], sizes = [8, 16], strides = [1, 1]} : vector<8x64xf32> to vector<8x16xf32>
    %cst_24 = arith.constant dense<0.000000e+00> : vector<8x8xf32>
    %26 = tpu.matmul %23, %24, %cst_24 {dimension_numbers = #tpu.dot_dimension_numbers<[1], [1], [0], [0], [0, 0, 1, 0], [], []>} : vector<8x16xf32>, vector<8x16xf32>, vector<8x8xf32> -> vector<8x8xf32>
    %cst_25 = arith.constant dense<0xFF800000> : vector<8xf32>
    %27 = vector.multi_reduction <maximumf>, %26, %cst_25 [1] : vector<8x8xf32> to vector<8xf32>
    %28 = vector.shape_cast %27 : vector<8xf32> to vector<8x1xf32>
    %29 = vector.broadcast %28 : vector<8x1xf32> to vector<8x8xf32>
    %30 = arith.subf %26, %29 : vector<8x8xf32>
    %31 = math.exp %30 : vector<8x8xf32>
    %cst_26 = arith.constant dense<0.000000e+00> : vector<8xf32>
    %32 = vector.multi_reduction <add>, %31, %cst_26 [1] : vector<8x8xf32> to vector<8xf32>
    %33 = vector.shape_cast %32 : vector<8xf32> to vector<8x1xf32>
    %34 = tpu.reciprocal %33 {approx = true} : vector<8x1xf32> -> vector<8x1xf32>
    %35 = vector.broadcast %34 : vector<8x1xf32> to vector<8x8xf32>
    %36 = arith.mulf %31, %35 : vector<8x8xf32>
    %cst_27 = arith.constant dense<0.000000e+00> : vector<8x16xf32>
    %37 = tpu.matmul %36, %25, %cst_27 {dimension_numbers = #tpu.dot_dimension_numbers<[1], [0], [0], [1], [0, 0, 1, 1], [], []>} : vector<8x8xf32>, vector<8x16xf32>, vector<8x16xf32> -> vector<8x16xf32>
    %38 = vector.extract_strided_slice %20 {offsets = [0, 16], sizes = [8, 16], strides = [1, 1]} : vector<8x64xf32> to vector<8x16xf32>
    %39 = vector.extract_strided_slice %21 {offsets = [0, 16], sizes = [8, 16], strides = [1, 1]} : vector<8x64xf32> to vector<8x16xf32>
    %40 = vector.extract_strided_slice %22 {offsets = [0, 16], sizes = [8, 16], strides = [1, 1]} : vector<8x64xf32> to vector<8x16xf32>
    %cst_28 = arith.constant dense<0.000000e+00> : vector<8x8xf32>
    %41 = tpu.matmul %38, %39, %cst_28 {dimension_numbers = #tpu.dot_dimension_numbers<[1], [1], [0], [0], [0, 0, 1, 0], [], []>} : vector<8x16xf32>, vector<8x16xf32>, vector<8x8xf32> -> vector<8x8xf32>
    %cst_29 = arith.constant dense<0xFF800000> : vector<8xf32>
    %42 = vector.multi_reduction <maximumf>, %41, %cst_29 [1] : vector<8x8xf32> to vector<8xf32>
    %43 = vector.shape_cast %42 : vector<8xf32> to vector<8x1xf32>
    %44 = vector.broadcast %43 : vector<8x1xf32> to vector<8x8xf32>
    %45 = arith.subf %41, %44 : vector<8x8xf32>
    %46 = math.exp %45 : vector<8x8xf32>
    %cst_30 = arith.constant dense<0.000000e+00> : vector<8xf32>
    %47 = vector.multi_reduction <add>, %46, %cst_30 [1] : vector<8x8xf32> to vector<8xf32>
    %48 = vector.shape_cast %47 : vector<8xf32> to vector<8x1xf32>
    %49 = tpu.reciprocal %48 {approx = true} : vector<8x1xf32> -> vector<8x1xf32>
    %50 = vector.broadcast %49 : vector<8x1xf32> to vector<8x8xf32>
    %51 = arith.mulf %46, %50 : vector<8x8xf32>
    %cst_31 = arith.constant dense<0.000000e+00> : vector<8x16xf32>
    %52 = tpu.matmul %51, %40, %cst_31 {dimension_numbers = #tpu.dot_dimension_numbers<[1], [0], [0], [1], [0, 0, 1, 1], [], []>} : vector<8x8xf32>, vector<8x16xf32>, vector<8x16xf32> -> vector<8x16xf32>
    %53 = vector.extract_strided_slice %20 {offsets = [0, 32], sizes = [8, 16], strides = [1, 1]} : vector<8x64xf32> to vector<8x16xf32>
    %54 = vector.extract_strided_slice %21 {offsets = [0, 32], sizes = [8, 16], strides = [1, 1]} : vector<8x64xf32> to vector<8x16xf32>
    %55 = vector.extract_strided_slice %22 {offsets = [0, 32], sizes = [8, 16], strides = [1, 1]} : vector<8x64xf32> to vector<8x16xf32>
    %cst_32 = arith.constant dense<0.000000e+00> : vector<8x8xf32>
    %56 = tpu.matmul %53, %54, %cst_32 {dimension_numbers = #tpu.dot_dimension_numbers<[1], [1], [0], [0], [0, 0, 1, 0], [], []>} : vector<8x16xf32>, vector<8x16xf32>, vector<8x8xf32> -> vector<8x8xf32>
    %cst_33 = arith.constant dense<0xFF800000> : vector<8xf32>
    %57 = vector.multi_reduction <maximumf>, %56, %cst_33 [1] : vector<8x8xf32> to vector<8xf32>
    %58 = vector.shape_cast %57 : vector<8xf32> to vector<8x1xf32>
    %59 = vector.broadcast %58 : vector<8x1xf32> to vector<8x8xf32>
    %60 = arith.subf %56, %59 : vector<8x8xf32>
    %61 = math.exp %60 : vector<8x8xf32>
    %cst_34 = arith.constant dense<0.000000e+00> : vector<8xf32>
    %62 = vector.multi_reduction <add>, %61, %cst_34 [1] : vector<8x8xf32> to vector<8xf32>
    %63 = vector.shape_cast %62 : vector<8xf32> to vector<8x1xf32>
    %64 = tpu.reciprocal %63 {approx = true} : vector<8x1xf32> -> vector<8x1xf32>
    %65 = vector.broadcast %64 : vector<8x1xf32> to vector<8x8xf32>
    %66 = arith.mulf %61, %65 : vector<8x8xf32>
    %cst_35 = arith.constant dense<0.000000e+00> : vector<8x16xf32>
    %67 = tpu.matmul %66, %55, %cst_35 {dimension_numbers = #tpu.dot_dimension_numbers<[1], [0], [0], [1], [0, 0, 1, 1], [], []>} : vector<8x8xf32>, vector<8x16xf32>, vector<8x16xf32> -> vector<8x16xf32>
    %68 = vector.extract_strided_slice %20 {offsets = [0, 48], sizes = [8, 16], strides = [1, 1]} : vector<8x64xf32> to vector<8x16xf32>
    %69 = vector.extract_strided_slice %21 {offsets = [0, 48], sizes = [8, 16], strides = [1, 1]} : vector<8x64xf32> to vector<8x16xf32>
    %70 = vector.extract_strided_slice %22 {offsets = [0, 48], sizes = [8, 16], strides = [1, 1]} : vector<8x64xf32> to vector<8x16xf32>
    %cst_36 = arith.constant dense<0.000000e+00> : vector<8x8xf32>
    %71 = tpu.matmul %68, %69, %cst_36 {dimension_numbers = #tpu.dot_dimension_numbers<[1], [1], [0], [0], [0, 0, 1, 0], [], []>} : vector<8x16xf32>, vector<8x16xf32>, vector<8x8xf32> -> vector<8x8xf32>
    %cst_37 = arith.constant dense<0xFF800000> : vector<8xf32>
    %72 = vector.multi_reduction <maximumf>, %71, %cst_37 [1] : vector<8x8xf32> to vector<8xf32>
    %73 = vector.shape_cast %72 : vector<8xf32> to vector<8x1xf32>
    %74 = vector.broadcast %73 : vector<8x1xf32> to vector<8x8xf32>
    %75 = arith.subf %71, %74 : vector<8x8xf32>
    %76 = math.exp %75 : vector<8x8xf32>
    %cst_38 = arith.constant dense<0.000000e+00> : vector<8xf32>
    %77 = vector.multi_reduction <add>, %76, %cst_38 [1] : vector<8x8xf32> to vector<8xf32>
    %78 = vector.shape_cast %77 : vector<8xf32> to vector<8x1xf32>
    %79 = tpu.reciprocal %78 {approx = true} : vector<8x1xf32> -> vector<8x1xf32>
    %80 = vector.broadcast %79 : vector<8x1xf32> to vector<8x8xf32>
    %81 = arith.mulf %76, %80 : vector<8x8xf32>
    %cst_39 = arith.constant dense<0.000000e+00> : vector<8x16xf32>
    %82 = tpu.matmul %81, %70, %cst_39 {dimension_numbers = #tpu.dot_dimension_numbers<[1], [0], [0], [1], [0, 0, 1, 1], [], []>} : vector<8x8xf32>, vector<8x16xf32>, vector<8x16xf32> -> vector<8x16xf32>
    %83 = tpu.concatenate %37, %52, %67, %82 in 1 : vector<8x16xf32>, vector<8x16xf32>, vector<8x16xf32>, vector<8x16xf32> -> vector<8x64xf32>
    %cst_40 = arith.constant dense<0.000000e+00> : vector<8x32xf32>
    %84 = tpu.matmul %83, %18, %cst_40 {dimension_numbers = #tpu.dot_dimension_numbers<[1], [0], [0], [1], [0, 0, 1, 1], [], []>} : vector<8x64xf32>, vector<64x32xf32>, vector<8x32xf32> -> vector<8x32xf32>
    %85 = vector.broadcast %19 : vector<1x32xf32> to vector<8x32xf32>
    %86 = arith.addf %84, %85 : vector<8x32xf32>
    %c0_41 = arith.constant 0 : index
    %c0_42 = arith.constant 0 : index
    %c0_43 = arith.constant 0 : index
    %87 = vector.load %arg11[%c0_41, %c0_42, %c0_43] : memref<2x8x32xf32, #tpu.memory_space<vmem>>, vector<1x8x32xf32>
    %88 = vector.shape_cast %87 : vector<1x8x32xf32> to vector<8x32xf32>
    %89 = vector.shape_cast %86 : vector<8x32xf32> to vector<1x8x32xf32>
    tpu.vector_store %arg11[%c0_41, %c0_42, %c0_43], %89 {strides = array<i32>} : memref<2x8x32xf32, #tpu.memory_space<vmem>>, vector<1x8x32xf32>,
    %90 = vector.extract_strided_slice %10 {offsets = [8, 0], sizes = [8, 64], strides = [1, 1]} : vector<16x64xf32> to vector<8x64xf32>
    %91 = vector.extract_strided_slice %12 {offsets = [8, 0], sizes = [8, 64], strides = [1, 1]} : vector<16x64xf32> to vector<8x64xf32>
    %92 = vector.extract_strided_slice %17 {offsets = [8, 0], sizes = [8, 64], strides = [1, 1]} : vector<16x64xf32> to vector<8x64xf32>
    %93 = vector.extract_strided_slice %90 {offsets = [0, 0], sizes = [8, 16], strides = [1, 1]} : vector<8x64xf32> to vector<8x16xf32>
    %94 = vector.extract_strided_slice %91 {offsets = [0, 0], sizes = [8, 16], strides = [1, 1]} : vector<8x64xf32> to vector<8x16xf32>
    %95 = vector.extract_strided_slice %92 {offsets = [0, 0], sizes = [8, 16], strides = [1, 1]} : vector<8x64xf32> to vector<8x16xf32>
    %cst_44 = arith.constant dense<0.000000e+00> : vector<8x8xf32>
    %96 = tpu.matmul %93, %94, %cst_44 {dimension_numbers = #tpu.dot_dimension_numbers<[1], [1], [0], [0], [0, 0, 1, 0], [], []>} : vector<8x16xf32>, vector<8x16xf32>, vector<8x8xf32> -> vector<8x8xf32>
    %cst_45 = arith.constant dense<0xFF800000> : vector<8xf32>
    %97 = vector.multi_reduction <maximumf>, %96, %cst_45 [1] : vector<8x8xf32> to vector<8xf32>
    %98 = vector.shape_cast %97 : vector<8xf32> to vector<8x1xf32>
    %99 = vector.broadcast %98 : vector<8x1xf32> to vector<8x8xf32>
    %100 = arith.subf %96, %99 : vector<8x8xf32>
    %101 = math.exp %100 : vector<8x8xf32>
    %cst_46 = arith.constant dense<0.000000e+00> : vector<8xf32>
    %102 = vector.multi_reduction <add>, %101, %cst_46 [1] : vector<8x8xf32> to vector<8xf32>
    %103 = vector.shape_cast %102 : vector<8xf32> to vector<8x1xf32>
    %104 = tpu.reciprocal %103 {approx = true} : vector<8x1xf32> -> vector<8x1xf32>
    %105 = vector.broadcast %104 : vector<8x1xf32> to vector<8x8xf32>
    %106 = arith.mulf %101, %105 : vector<8x8xf32>
    %cst_47 = arith.constant dense<0.000000e+00> : vector<8x16xf32>
    %107 = tpu.matmul %106, %95, %cst_47 {dimension_numbers = #tpu.dot_dimension_numbers<[1], [0], [0], [1], [0, 0, 1, 1], [], []>} : vector<8x8xf32>, vector<8x16xf32>, vector<8x16xf32> -> vector<8x16xf32>
    %108 = vector.extract_strided_slice %90 {offsets = [0, 16], sizes = [8, 16], strides = [1, 1]} : vector<8x64xf32> to vector<8x16xf32>
    %109 = vector.extract_strided_slice %91 {offsets = [0, 16], sizes = [8, 16], strides = [1, 1]} : vector<8x64xf32> to vector<8x16xf32>
    %110 = vector.extract_strided_slice %92 {offsets = [0, 16], sizes = [8, 16], strides = [1, 1]} : vector<8x64xf32> to vector<8x16xf32>
    %cst_48 = arith.constant dense<0.000000e+00> : vector<8x8xf32>
    %111 = tpu.matmul %108, %109, %cst_48 {dimension_numbers = #tpu.dot_dimension_numbers<[1], [1], [0], [0], [0, 0, 1, 0], [], []>} : vector<8x16xf32>, vector<8x16xf32>, vector<8x8xf32> -> vector<8x8xf32>
    %cst_49 = arith.constant dense<0xFF800000> : vector<8xf32>
    %112 = vector.multi_reduction <maximumf>, %111, %cst_49 [1] : vector<8x8xf32> to vector<8xf32>
    %113 = vector.shape_cast %112 : vector<8xf32> to vector<8x1xf32>
    %114 = vector.broadcast %113 : vector<8x1xf32> to vector<8x8xf32>
    %115 = arith.subf %111, %114 : vector<8x8xf32>
    %116 = math.exp %115 : vector<8x8xf32>
    %cst_50 = arith.constant dense<0.000000e+00> : vector<8xf32>
    %117 = vector.multi_reduction <add>, %116, %cst_50 [1] : vector<8x8xf32> to vector<8xf32>
    %118 = vector.shape_cast %117 : vector<8xf32> to vector<8x1xf32>
    %119 = tpu.reciprocal %118 {approx = true} : vector<8x1xf32> -> vector<8x1xf32>
    %120 = vector.broadcast %119 : vector<8x1xf32> to vector<8x8xf32>
    %121 = arith.mulf %116, %120 : vector<8x8xf32>
    %cst_51 = arith.constant dense<0.000000e+00> : vector<8x16xf32>
    %122 = tpu.matmul %121, %110, %cst_51 {dimension_numbers = #tpu.dot_dimension_numbers<[1], [0], [0], [1], [0, 0, 1, 1], [], []>} : vector<8x8xf32>, vector<8x16xf32>, vector<8x16xf32> -> vector<8x16xf32>
    %123 = vector.extract_strided_slice %90 {offsets = [0, 32], sizes = [8, 16], strides = [1, 1]} : vector<8x64xf32> to vector<8x16xf32>
    %124 = vector.extract_strided_slice %91 {offsets = [0, 32], sizes = [8, 16], strides = [1, 1]} : vector<8x64xf32> to vector<8x16xf32>
    %125 = vector.extract_strided_slice %92 {offsets = [0, 32], sizes = [8, 16], strides = [1, 1]} : vector<8x64xf32> to vector<8x16xf32>
    %cst_52 = arith.constant dense<0.000000e+00> : vector<8x8xf32>
    %126 = tpu.matmul %123, %124, %cst_52 {dimension_numbers = #tpu.dot_dimension_numbers<[1], [1], [0], [0], [0, 0, 1, 0], [], []>} : vector<8x16xf32>, vector<8x16xf32>, vector<8x8xf32> -> vector<8x8xf32>
    %cst_53 = arith.constant dense<0xFF800000> : vector<8xf32>
    %127 = vector.multi_reduction <maximumf>, %126, %cst_53 [1] : vector<8x8xf32> to vector<8xf32>
    %128 = vector.shape_cast %127 : vector<8xf32> to vector<8x1xf32>
    %129 = vector.broadcast %128 : vector<8x1xf32> to vector<8x8xf32>
    %130 = arith.subf %126, %129 : vector<8x8xf32>
    %131 = math.exp %130 : vector<8x8xf32>
    %cst_54 = arith.constant dense<0.000000e+00> : vector<8xf32>
    %132 = vector.multi_reduction <add>, %131, %cst_54 [1] : vector<8x8xf32> to vector<8xf32>
    %133 = vector.shape_cast %132 : vector<8xf32> to vector<8x1xf32>
    %134 = tpu.reciprocal %133 {approx = true} : vector<8x1xf32> -> vector<8x1xf32>
    %135 = vector.broadcast %134 : vector<8x1xf32> to vector<8x8xf32>
    %136 = arith.mulf %131, %135 : vector<8x8xf32>
    %cst_55 = arith.constant dense<0.000000e+00> : vector<8x16xf32>
    %137 = tpu.matmul %136, %125, %cst_55 {dimension_numbers = #tpu.dot_dimension_numbers<[1], [0], [0], [1], [0, 0, 1, 1], [], []>} : vector<8x8xf32>, vector<8x16xf32>, vector<8x16xf32> -> vector<8x16xf32>
    %138 = vector.extract_strided_slice %90 {offsets = [0, 48], sizes = [8, 16], strides = [1, 1]} : vector<8x64xf32> to vector<8x16xf32>
    %139 = vector.extract_strided_slice %91 {offsets = [0, 48], sizes = [8, 16], strides = [1, 1]} : vector<8x64xf32> to vector<8x16xf32>
    %140 = vector.extract_strided_slice %92 {offsets = [0, 48], sizes = [8, 16], strides = [1, 1]} : vector<8x64xf32> to vector<8x16xf32>
    %cst_56 = arith.constant dense<0.000000e+00> : vector<8x8xf32>
    %141 = tpu.matmul %138, %139, %cst_56 {dimension_numbers = #tpu.dot_dimension_numbers<[1], [1], [0], [0], [0, 0, 1, 0], [], []>} : vector<8x16xf32>, vector<8x16xf32>, vector<8x8xf32> -> vector<8x8xf32>
    %cst_57 = arith.constant dense<0xFF800000> : vector<8xf32>
    %142 = vector.multi_reduction <maximumf>, %141, %cst_57 [1] : vector<8x8xf32> to vector<8xf32>
    %143 = vector.shape_cast %142 : vector<8xf32> to vector<8x1xf32>
    %144 = vector.broadcast %143 : vector<8x1xf32> to vector<8x8xf32>
    %145 = arith.subf %141, %144 : vector<8x8xf32>
    %146 = math.exp %145 : vector<8x8xf32>
    %cst_58 = arith.constant dense<0.000000e+00> : vector<8xf32>
    %147 = vector.multi_reduction <add>, %146, %cst_58 [1] : vector<8x8xf32> to vector<8xf32>
    %148 = vector.shape_cast %147 : vector<8xf32> to vector<8x1xf32>
    %149 = tpu.reciprocal %148 {approx = true} : vector<8x1xf32> -> vector<8x1xf32>
    %150 = vector.broadcast %149 : vector<8x1xf32> to vector<8x8xf32>
    %151 = arith.mulf %146, %150 : vector<8x8xf32>
    %cst_59 = arith.constant dense<0.000000e+00> : vector<8x16xf32>
    %152 = tpu.matmul %151, %140, %cst_59 {dimension_numbers = #tpu.dot_dimension_numbers<[1], [0], [0], [1], [0, 0, 1, 1], [], []>} : vector<8x8xf32>, vector<8x16xf32>, vector<8x16xf32> -> vector<8x16xf32>
    %153 = tpu.concatenate %107, %122, %137, %152 in 1 : vector<8x16xf32>, vector<8x16xf32>, vector<8x16xf32>, vector<8x16xf32> -> vector<8x64xf32>
    %cst_60 = arith.constant dense<0.000000e+00> : vector<8x32xf32>
    %154 = tpu.matmul %153, %18, %cst_60 {dimension_numbers = #tpu.dot_dimension_numbers<[1], [0], [0], [1], [0, 0, 1, 1], [], []>} : vector<8x64xf32>, vector<64x32xf32>, vector<8x32xf32> -> vector<8x32xf32>
    %155 = vector.broadcast %19 : vector<1x32xf32> to vector<8x32xf32>
    %156 = arith.addf %154, %155 : vector<8x32xf32>
    %c1 = arith.constant 1 : index
    %c0_61 = arith.constant 0 : index
    %c0_62 = arith.constant 0 : index
    %157 = vector.load %arg11[%c1, %c0_61, %c0_62] : memref<2x8x32xf32, #tpu.memory_space<vmem>>, vector<1x8x32xf32>
    %158 = vector.shape_cast %157 : vector<1x8x32xf32> to vector<8x32xf32>
    %159 = vector.shape_cast %156 : vector<8x32xf32> to vector<1x8x32xf32>
    tpu.vector_store %arg11[%c1, %c0_61, %c0_62], %159 {strides = array<i32>} : memref<2x8x32xf32, #tpu.memory_space<vmem>>, vector<1x8x32xf32>,
    return
  }
  func.func @transform_0(%arg0: i32) -> (i32, i32, i32) {
    %c0_i32 = arith.constant 0 : i32
    %c0_i32_0 = arith.constant 0 : i32
    %c0_i32_1 = arith.constant 0 : i32
    return %arg0, %c0_i32, %c0_i32_0 : i32, i32, i32
  }
  func.func @transform_1(%arg0: i32) -> (i32, i32, i32) {
    %c0_i32 = arith.constant 0 : i32
    %c0_i32_0 = arith.constant 0 : i32
    %c0_i32_1 = arith.constant 0 : i32
    return %arg0, %c0_i32, %c0_i32_0 : i32, i32, i32
  }
  func.func @transform_2(%arg0: i32) -> (i32, i32, i32) {
    %c0_i32 = arith.constant 0 : i32
    %c0_i32_0 = arith.constant 0 : i32
    %c0_i32_1 = arith.constant 0 : i32
    return %arg0, %c0_i32, %c0_i32_0 : i32, i32, i32
  }
  func.func @transform_3(%arg0: i32) -> (i32, i32) {
    %c0_i32 = arith.constant 0 : i32
    %c0_i32_0 = arith.constant 0 : i32
    %c0_i32_1 = arith.constant 0 : i32
    return %c0_i32, %c0_i32_0 : i32, i32
  }
  func.func @transform_4(%arg0: i32) -> (i32, i32) {
    %c0_i32 = arith.constant 0 : i32
    %c0_i32_0 = arith.constant 0 : i32
    %c0_i32_1 = arith.constant 0 : i32
    return %c0_i32, %c0_i32_0 : i32, i32
  }
  func.func @transform_5(%arg0: i32) -> (i32, i32) {
    %c0_i32 = arith.constant 0 : i32
    %c0_i32_0 = arith.constant 0 : i32
    %c0_i32_1 = arith.constant 0 : i32
    return %c0_i32, %c0_i32_0 : i32, i32
  }
  func.func @transform_6(%arg0: i32) -> (i32, i32) {
    %c0_i32 = arith.constant 0 : i32
    %c0_i32_0 = arith.constant 0 : i32
    %c0_i32_1 = arith.constant 0 : i32
    return %c0_i32, %c0_i32_0 : i32, i32
  }
  func.func @transform_7(%arg0: i32) -> (i32, i32) {
    %c0_i32 = arith.constant 0 : i32
    %c0_i32_0 = arith.constant 0 : i32
    %c0_i32_1 = arith.constant 0 : i32
    return %c0_i32, %c0_i32_0 : i32, i32
  }
  func.func @transform_8(%arg0: i32) -> (i32, i32) {
    %c0_i32 = arith.constant 0 : i32
    %c0_i32_0 = arith.constant 0 : i32
    %c0_i32_1 = arith.constant 0 : i32
    return %c0_i32, %c0_i32_0 : i32, i32
  }
  func.func @transform_9(%arg0: i32) -> (i32, i32) {
    %c0_i32 = arith.constant 0 : i32
    %c0_i32_0 = arith.constant 0 : i32
    %c0_i32_1 = arith.constant 0 : i32
    return %c0_i32, %c0_i32_0 : i32, i32
  }
  func.func @transform_10(%arg0: i32) -> (i32, i32, i32) {
    %c0_i32 = arith.constant 0 : i32
    %c0_i32_0 = arith.constant 0 : i32
    %c0_i32_1 = arith.constant 0 : i32
    return %arg0, %c0_i32, %c0_i32_0 : i32, i32, i32
  }
}

</mosaic_0001>

<bundles_post_ra>
// kernel: tpu_custom_call.1
= control target key start
LH: loop header
LB: loop body
LE: loop exit
PB: predicated region body
PF: predicated region fallthrough
CT: control target
= control target key end

     0   :  { %15 = vsyncpa [#allocation3], 0  ;;  %s2701_s0 = inlined_call_operand.hbm [shape: f32[2,8,32], index: 0, kind: input, shape index: {}]   ;;  %s2702_s1 = inlined_call_operand.hbm [shape: f32[2,8,32], index: 1, kind: input, shape index: {}]   ;;  %s2703_s2 = inlined_call_operand.hbm [shape: f32[2,8,32], index: 2, kind: input, shape index: {}]   ;;  %s2704_s3 = inlined_call_operand.vmem [shape: f32[32,64], index: 3, kind: input, shape index: {}]   ;;  %s2705_s4 = inlined_call_operand.vmem [shape: f32[1,64], index: 4, kind: input, shape index: {}]   ;;  %s2706_s5 = inlined_call_operand.vmem [shape: f32[32,64], index: 5, kind: input, shape index: {}]   ;;  %s2707_s6 = inlined_call_operand.vmem [shape: f32[32,64], index: 6, kind: input, shape index: {}]   ;;  %s2708_s7 = inlined_call_operand.vmem [shape: f32[1,64], index: 7, kind: input, shape index: {}]   ;;  %s2709_s8 = inlined_call_operand.vmem [shape: f32[64,32], index: 8, kind: input, shape index: {}]   ;;  %s2710_s9 = inlined_call_operand.vmem [shape: f32[1,32], index: 9, kind: input, shape index: {}]   ;;  %s2711_s10 = inlined_call_operand.hbm [shape: f32[2,8,32], index: 10, kind: output, shape index: {}]  }
   0x1   :  { %16 = vsyncpa [#allocation6], 0 }
   0x2   :  { %17 = vsyncpa [#allocation4], 0  ;;  %s2324_s13 = smov [#allocation5]   ;;  %s2325_s15 = smov [#allocation2]  }
   0x3   :  { %s35_s14 = sshll.u32 %s2324_s13, 4  ;;  %s23_s16 = sshll.u32 %s2325_s15, 4  ;;  %s36_s14 = int_to_ptr.vmem [resolvable:$true] %s35_s14  ;;  %s2394_s16 = int_to_ptr.vmem [resolvable:$true] %s23_s16 }
   0x4   :  { %s2230_s19 = scalar_lea.hbm %s2702_s1, 256 }
   0x5   :  { %p2231_p0 = scmp.ne.s32.totalorder %s2702_s1, %s2230_s19  ;;  %p2234_p1 = scmp.lt.u32.totalorder %s2230_s19, %s2702_s1 }
   0x7   :  { %p2236_p2 = pnand %p2234_p1, %p2231_p0 }
   0x9   :  { %2239 = shalt.err (!%p2236_p2)
}
   0xa   :  { %s2240_s24 = scalar_lea.vmem %s36_s14, 256  ;;  %p2245_p4 = scmp.lt.s32.totalorder %s36_s14, %s36_s14 }
   0xb   :  { %p2241_p3 = scmp.ne.s32.totalorder %s36_s14, %s2240_s24  ;;  %p2246_p5 = scmp.lt.s32.totalorder %s2240_s24, %s2240_s24 }
   0xd   :  { %p2247_p6 = por %p2246_p5, %p2245_p4 }
   0xf   :  { %p2248_p7 = pnand %p2247_p6, %p2241_p3 }
  0x11   :  { %2251 = shalt.err (!%p2248_p7)
}
  0x12   :  { %s2326_s25 = smov 128   ;;  %s2327_s26 = smov 8  }
  0x13   :  { %41 = dma.hbm_to_vmem [thread:$0]  %s2702_s1, 256, %s36_s14, [#allocation6], %s2326_s25, %s2326_s25, %s2327_s26  }
  0x14   :  { %s2252_s11 = scalar_lea.hbm %s2701_s0, 256 }
  0x15   :  { %p2253_p8 = scmp.ne.s32.totalorder %s2701_s0, %s2252_s11  ;;  %p2256_p9 = scmp.lt.u32.totalorder %s2252_s11, %s2701_s0 }
  0x17   :  { %p2258_p10 = pnand %p2256_p9, %p2253_p8 }
  0x19   :  { %2261 = shalt.err (!%p2258_p10)
}
  0x1a   :  { %s2262_s18 = scalar_lea.vmem %s2394_s16, 256  ;;  %p2267_p12 = scmp.lt.s32.totalorder %s2394_s16, %s2394_s16 }
  0x1b   :  { %p2263_p11 = scmp.ne.s32.totalorder %s2394_s16, %s2262_s18  ;;  %p2268_p13 = scmp.lt.s32.totalorder %s2262_s18, %s2262_s18 }
  0x1d   :  { %p2269_p0 = por %p2268_p13, %p2267_p12 }
  0x1f   :  { %p2270_p1 = pnand %p2269_p0, %p2263_p11 }
  0x21   :  { %2273 = shalt.err (!%p2270_p1)
}
  0x22   :  { %29 = dma.hbm_to_vmem [thread:$0]  %s2701_s0, 256, %s2394_s16, [#allocation3], %s2326_s25, %s2326_s25, %s2327_s26  }
  0x23   :  { %s2328_s19 = smov [#allocation7]   ;;  %s2274_s23 = scalar_lea.hbm %s2703_s2, 256 }
  0x24   :  { %s47_s20 = sshll.u32 %s2328_s19, 4  ;;  %p2275_p2 = scmp.ne.s32.totalorder %s2703_s2, %s2274_s23  ;;  %s48_s20 = int_to_ptr.vmem [resolvable:$true] %s47_s20 }
  0x25   :  { %p2278_p3 = scmp.lt.u32.totalorder %s2274_s23, %s2703_s2 }
  0x27   :  { %p2280_p4 = pnand %p2278_p3, %p2275_p2 }
  0x29   :  { %2283 = shalt.err (!%p2280_p4)
}
  0x2a   :  { %s2284_s30 = scalar_lea.vmem %s48_s20, 256  ;;  %p2289_p6 = scmp.lt.s32.totalorder %s48_s20, %s48_s20 }
  0x2b   :  { %p2285_p5 = scmp.ne.s32.totalorder %s48_s20, %s2284_s30  ;;  %p2290_p7 = scmp.lt.s32.totalorder %s2284_s30, %s2284_s30 }
  0x2d   :  { %p2291_p8 = por %p2290_p7, %p2289_p6 }
  0x2f   :  { %p2292_p9 = pnand %p2291_p8, %p2285_p5 }
  0x31   :  { %2295 = shalt.err (!%p2292_p9)
}
  0x32   :  { %53 = dma.hbm_to_vmem [thread:$0]  %s2703_s2, 256, %s48_s20, [#allocation6], %s2326_s25, %s2326_s25, %s2327_s26  }
  0x33   :  { %2318 = dma.done.wait [#allocation3], 256  }
  0x34   :  { %2319 = vsyncadd [#allocation3], 4294967040 }
  0x35   :  { %2320 = dma.done.wait [#allocation6], 512  }
  0x36   :  { %2321 = vsyncadd [#allocation6], 4294966784  ;;  %vm94_vm0 = vcmask 261120   ;;  %v83_v0 = vld [vmem:[%s2704_s3] sm:$0xff]  ;;  %v84_v1 = vld [vmem:[%s2704_s3 + $0x8] sm:$0xff]  ;;  %v2329_v16 = vmov 0.0  }
  0x37   :  { %v85_v2 = vld [vmem:[%s2704_s3 + $0x10] sm:$0xff]  ;;  %v2135_v3 = vpack.c.bf16 %v84_v1, %v83_v0  ;;  %v86_v4 = vld [vmem:[%s2704_s3 + $0x18] sm:$0xff]  ;;  %v77_v5 = vld [vmem:[#allocation2] sm:$0xff]  ;;  %vm2330_vm1 = vmmov 0   ;;  %vm362_vm2 = vcmask 130048   ;;  %s2332_s15 = smov 112  }
  0x38   :  { %v2139_v6 = vpack.c.bf16 %v86_v4, %v85_v2  ;;  %1992 = vmatprep.mubr.msk.f32.mxu1 %vm94_vm0, %v77_v5  ;;  %v176_v7 = vld [vmem:[%s2706_s5] sm:$0xff]  ;;  %v177_v8 = vld [vmem:[%s2706_s5 + $0x8] sm:$0xff]  ;;  %v178_v10 = vld [vmem:[%s2706_s5 + $0x10] sm:$0xff]  ;;  %vm439_vm3 = vcmask 64512   ;;  %s2335_s1 = smov 32   ;;  %s2337_s11 = smov 48  }
  0x39   :  { %2136 = vmatprep.subr.bf16.mxu1 %v2135_v3  ;;  %v2143_v9 = vpack.c.bf16 %v177_v8, %v176_v7  ;;  %v179_v11 = vld [vmem:[%s2706_s5 + $0x18] sm:$0xff]  ;;  %v78_v12 = vld [vmem:[#allocation2 + $0x8] sm:$0xff]  ;;  %v79_v14 = vld [vmem:[#allocation5] sm:$0xff]  ;;  %vm1034_vm4 = vcmask 392192   ;;  %vm1042_vm5 = vcmask 523264  }
  0x3a   :  { %2138 = vmatpush3.bf16.msra.mxu1 %v2135_v3  ;;  %v2147_v13 = vpack.c.bf16 %v179_v11, %v178_v10  ;;  %v80_v15 = vld [vmem:[#allocation5 + $0x8] sm:$0xff]  ;;  %v261_v17 = vld [vmem:[%s2707_s6] sm:$0xff]  ;;  %v262_v18 = vld [vmem:[%s2707_s6 + $0x8] sm:$0xff] }
  0x3b   :  { %2140 = vmatprep.subr.bf16.mxu1 %v2139_v6  ;;  %v263_v19 = vld [vmem:[%s2707_s6 + $0x10] sm:$0xff]  ;;  %v2151_v20 = vpack.c.bf16 %v262_v18, %v261_v17  ;;  %v264_v21 = vld [vmem:[%s2707_s6 + $0x18] sm:$0xff]  ;;  %v81_v22 = vld [vmem:[#allocation7] sm:$0xff]  ;;  %s2331_s6 = smov 96  }
  0x3c   :  { %v2155_v23 = vpack.c.bf16 %v264_v21, %v263_v19  ;;  %2014 = vmatprep.mubr.msk.f32.mxu0 %vm94_vm0, %v81_v22  ;;  %v82_v24 = vld [vmem:[#allocation7 + $0x8] sm:$0xff]  ;;  %v1881_v25 = vld [vmem:[%s2705_s4] ss:$0 sm:$0xff]  ;;  %s2333_s4 = smov 80  }
  0x3d   :  { %2152 = vmatprep.subr.bf16.mxu0 %v2151_v20  ;;  %v1886_v32 = vld [vmem:[%s2708_s7] ss:$0 sm:$0xff]  ;;  %s2334_s7 = smov 16  }
  0x3e   :  { %2142 = vmatpush3.bf16.msra.mxu1 %v2139_v6  ;;  %2154 = vmatpush3.bf16.msra.mxu0 %v2151_v20 }
  0x3f   :  { %2144 = vmatprep.subr.bf16.mxu1 %v2143_v9  ;;  %2156 = vmatprep.subr.bf16.mxu0 %v2155_v23 }
  0x41   :  { %1993 = vmatmul.mubr.msk.f32.vlgmr.msra.gmra.mrb[0].mxu1 %vm94_vm0, %v78_v12 }
  0x42   :  { %2146 = vmatpush3.bf16.msra.mxu1 %v2143_v9  ;;  %2003 = vmatprep.mubr.msk.f32.mxu1 %vm94_vm0, %v79_v14 }
  0x43   :  { %2148 = vmatprep.subr.bf16.mxu1 %v2147_v13  ;;  %2158 = vmatpush3.bf16.msra.mxu0 %v2155_v23 }
  0x44   :  { %2027 = vmatprep.subr.mxu0 %v2329_v16 }
  0x46   :  { %2150 = vmatpush3.bf16.msra.mxu1 %v2147_v13  ;;  %2015 = vmatmul.mubr.msk.f32.vlgmr.msra.gmra.mrb[0].mxu0 %vm94_vm0, %v82_v24 }
  0x47   :  { %2017 = vmatprep.subr.mxu1 %v2329_v16  ;;  %2029 = vmatprep.mubr.msk.f32.mxu0 %vm2330_vm1, %v2329_v16 }
  0x49   :  { %2004 = vmatmul.mubr.msk.f32.vlgmr.msra.gmra.mrb[2].mxu1 %vm94_vm0, %v80_v15 }
  0x4a   :  { %2019 = vmatprep.mubr.msk.f32.mxu1 %vm2330_vm1, %v2329_v16 }
 0x114   :  { %v1994_v26 = vpop.f32.mrb[0].mxu1 }
 0x115   :  { %v2497_v27 = vadd.f32 %v1994_v26, %v1881_v25  ;;  %v167_v28 = vpop.f32.mrb[1].mxu1 }
 0x116   :  { %v168_v31 = vadd.f32 %v1881_v25, %v167_v28 }
 0x119   :  { %v2016_v33 = vpop.f32.mrb[0].mxu0 }
 0x11a   :  { %v2515_v34 = vadd.f32 %v2016_v33, %v1886_v32  ;;  %v344_v35 = vpop.f32.mrb[1].mxu0 }
 0x11b   :  { %v2517_v36 = vadd.f32 %v1886_v32, %v344_v35 }
 0x11c   :  { %v2499_v29 = vpop.f32.mrb[2].mxu1 }
 0x11d   :  { %v252_v30 = vpop.f32.mrb[3].mxu1 }
 0x11e   :  { %692 = vrot.lane.b32.xlu1 %v252_v30, %s2331_s6  ;;  %526 = vrot.lane.b32.xlu0 %v252_v30, %s2332_s15 }
 0x11f   :  { %2018 = vmatpush3.xpose.msk.msra.mxu1 %vm362_vm2, %v252_v30 }
 0x120   :  { %2022 = vmatprep.subr.mxu1 %v2329_v16 }
 0x122   :  { %2020 = vmatmul.mubr.msk.f32.vlgmr.msra.gmra.mrb[4].mxu1 %vm362_vm2, %v168_v31  ;;  %690 = vrot.lane.b32.xlu1 %v168_v31, %s2331_s6 }
 0x123   :  { %524 = vrot.lane.b32.xlu0 %v168_v31, %s2332_s15  ;;  %2024 = vmatprep.mubr.msk.f32.mxu1 %vm2330_vm1, %v2329_v16 }
 0x124   :  { %2023 = vmatpush3.msra.mxu1 %v2517_v36 }
 0x125   :  { %2032 = vmatprep.subr.mxu1 %v2329_v16 }
 0x126   :  { %855 = vrot.lane.b32.xlu1 %v168_v31, %s2333_s4 }
 0x127   :  { %857 = vrot.lane.b32.xlu0 %v252_v30, %s2333_s4 }
 0x190   :  { %v527_v37 = vpop.permute.xlu0 %526  ;;  %v693_v38 = vpop.permute.xlu1 %692 }
 0x191   :  { %2028 = vmatpush3.xpose.msk.msra.mxu0 %vm362_vm2, %v527_v37 }
 0x192   :  { %2037 = vmatprep.subr.mxu0 %v2329_v16 }
 0x194   :  { %v691_v40 = vpop.permute.xlu1 %690 }
 0x195   :  { %v525_v39 = vpop.permute.xlu0 %524 }
 0x196   :  { %2030 = vmatmul.mubr.msk.f32.vlgmr.msra.gmra.mrb[2].mxu0 %vm362_vm2, %v525_v39 }
 0x197   :  { %2038 = vmatpush3.xpose.msk.msra.mxu0 %vm362_vm2, %v693_v38  ;;  %2039 = vmatprep.mubr.msk.f32.mxu0 %vm2330_vm1, %v2329_v16 }
 0x198   :  { %2047 = vmatprep.subr.mxu0 %v2329_v16  ;;  %v856_v42 = vpop.permute.xlu1 %855 }
 0x199   :  { %v858_v41 = vpop.permute.xlu0 %857 }
 0x19a   :  { %2040 = vmatmul.mubr.msk.f32.vlgmr.msra.gmra.mrb[4].mxu0 %vm362_vm2, %v691_v40 }
 0x19b   :  { %2048 = vmatpush3.xpose.msk.msra.mxu0 %vm362_vm2, %v858_v41  ;;  %2049 = vmatprep.mubr.msk.f32.mxu0 %vm2330_vm1, %v2329_v16  ;;  %v353_v41 = vld [vmem:[%s2709_s8] sm:$0xff] }
 0x19e   :  { %2050 = vmatmul.mubr.msk.f32.vlgmr.msra.gmra.mrb[6].mxu0 %vm362_vm2, %v856_v42  ;;  %v354_v42 = vld [vmem:[%s2709_s8 + $0x8] sm:$0xff] }
 0x19f   :  { %2073 = vmatprep.mubr.msk.f32.mxu0 %vm2330_vm1, %v2329_v16 }
 0x1f5   :  { %v435_v43 = vpop.f32.mrb[4].mxu1 }
 0x1f6   :  { %v2021_v44 = vpop.f32.mrb[5].mxu1  ;;  %v440_v45 = vsel %vm439_vm3, %v435_v43, -inf }
 0x1f7   :  { %441 = vmax.xlane.f32.xlu0 %v440_v45  ;;  %v2336_v44 = vmov 0.0|0.0   ;;  %v2160_v45 = vpack.c.bf16 %v354_v42, %v353_v41 }
 0x1f8   :  { %2159 = vmatprep.subr.bf16.mxu0 %v2336_v44 }
 0x1f9   :  { %2161 = vmatpush3.bf16.msra.mxu0 %v2160_v45 }
 0x1fa   :  { %2162 = vmatprep.subr.bf16.mxu0 %v2336_v44 }
 0x269   :  { %v598_v46 = vpop.f32.mrb[2].mxu0 }
 0x26a   :  { %v2031_v47 = vpop.f32.mrb[3].mxu0  ;;  %v602_v48 = vsel %vm439_vm3, %v598_v46, -inf }
 0x26b   :  { %603 = vmax.xlane.f32.xlu1 %v602_v48  ;;  %v357_v47 = vld [vmem:[%s2709_s8 + $0x20] sm:$0xff]  ;;  %v358_v48 = vld [vmem:[%s2709_s8 + $0x28] sm:$0xff] }
 0x26d   :  { %v764_v49 = vpop.f32.mrb[4].mxu0 }
 0x26e   :  { %v2041_v50 = vpop.f32.mrb[5].mxu0  ;;  %v768_v51 = vsel %vm439_vm3, %v764_v49, -inf }
 0x26f   :  { %769 = vmax.xlane.f32.xlu0 %v768_v51  ;;  %v359_v50 = vld [vmem:[%s2709_s8 + $0x30] sm:$0xff]  ;;  %v360_v51 = vld [vmem:[%s2709_s8 + $0x38] sm:$0xff] }
 0x271   :  { %v929_v52 = vpop.f32.mrb[6].mxu0 }
 0x272   :  { %v2051_v53 = vpop.f32.mrb[7].mxu0  ;;  %v933_v54 = vsel %vm439_vm3, %v929_v52, -inf }
 0x273   :  { %934 = vmax.xlane.f32.xlu0 %v933_v54 }
 0x27c   :  { %614 = vrot.lane.b32.xlu1 %v2517_v36, %s2332_s15 }
 0x284   :  { %v442_v55 = vpop.xlane.xlu0 %441 }
 0x285   :  { %v443_v56 = vsub.f32 %v435_v43, %v442_v55  ;;  %v355_v43 = vld [vmem:[%s2709_s8 + $0x10] sm:$0xff] }
 0x287   :  { %v444_v57 = vmul.f32 1.442695, %v443_v56 }
 0x289   :  { %2198 = vpow2.f32 %v444_v57 }
 0x293   :  { %v2199_v58 = vpop.eup %2198 }
 0x294   :  { %v446_v59 = vsel %vm439_vm3, %v2199_v58, 0.0 }
 0x2a0   :  { %447 = vadd.xlane.f32.xlu1 %v446_v59 }
 0x2f8   :  { %v604_v60 = vpop.xlane.xlu1 %603 }
 0x2f9   :  { %v605_v61 = vsub.f32 %v598_v46, %v604_v60 }
 0x2fb   :  { %v606_v62 = vmul.f32 1.442695, %v605_v61 }
 0x2fc   :  { %v770_v63 = vpop.xlane.xlu0 %769  ;;  %v615_v11 = vpop.permute.xlu1 %614 }
 0x2fd   :  { %2200 = vpow2.f32 %v606_v62  ;;  %v771_v0 = vsub.f32 %v764_v49, %v770_v63  ;;  %v2166_v49 = vpack.c.bf16 %v358_v48, %v357_v47 }
 0x2ff   :  { %v772_v1 = vmul.f32 1.442695, %v771_v0 }
 0x300   :  { %v935_v2 = vpop.xlane.xlu0 %934 }
 0x301   :  { %2202 = vpow2.f32 %v772_v1  ;;  %v936_v3 = vsub.f32 %v929_v52, %v935_v2  ;;  %v2169_v52 = vpack.c.bf16 %v360_v51, %v359_v50 }
 0x303   :  { %v937_v4 = vmul.f32 1.442695, %v936_v3 }
 0x305   :  { %2204 = vpow2.f32 %v937_v4 }
 0x307   :  { %v2201_v5 = vpop.eup %2200 }
 0x308   :  { %v608_v6 = vsel %vm439_vm3, %v2201_v5, 0.0 }
 0x309   :  { %609 = vadd.xlane.f32.xlu0 %v608_v6 }
 0x30b   :  { %v2203_v7 = vpop.eup %2202 }
 0x30c   :  { %v774_v8 = vsel %vm439_vm3, %v2203_v7, 0.0 }
 0x30d   :  { %775 = vadd.xlane.f32.xlu1 %v774_v8  ;;  %v2649_v8 = vld [vmem:[%s2710_s9] ss:$0 sm:$0xff]  ;;  %s2338_s9 = smov [#allocation8]  }
 0x30e   :  { %s1868_s13 = sshll.u32 %s2338_s9, 4  ;;  %s1869_s13 = int_to_ptr.vmem [resolvable:$true] %s1868_s13 }
 0x30f   :  { %v2205_v9 = vpop.eup %2204  ;;  %p2301_p11 = scmp.lt.s32.totalorder %s1869_s13, %s1869_s13 }
 0x310   :  { %v939_v10 = vsel %vm439_vm3, %v2205_v9, 0.0 }
 0x311   :  { %940 = vadd.xlane.f32.xlu0 %v939_v10 }
 0x31e   :  { %944 = vrot.lane.b32.xlu1 %v2517_v36, %s2333_s4 }
 0x327   :  { %779 = vrot.lane.b32.xlu0 %v2517_v36, %s2331_s6 }
 0x32d   :  { %v448_v12 = vpop.xlane.xlu1 %447 }
 0x32e   :  { %2206 = vrcp.f32 %v448_v12 }
 0x338   :  { %v2207_v13 = vpop.eup %2206 }
 0x339   :  { %v450_v14 = vmul.f32 %v2207_v13, %v2199_v58 }
 0x33b   :  { %2025 = vmatmul.mubr.msk.f32.vlgmr.msra.gmra.mrb[6].mxu1 %vm439_vm3, %v450_v14 }
 0x33c   :  { %2033 = vmatpush3.msra.mxu1 %v615_v11  ;;  %2034 = vmatprep.mubr.msk.f32.mxu1 %vm2330_vm1, %v2329_v16 }
 0x33d   :  { %2042 = vmatprep.subr.mxu1 %v2329_v16 }
 0x396   :  { %v610_v15 = vpop.xlane.xlu0 %609 }
 0x397   :  { %2208 = vrcp.f32 %v610_v15 }
 0x39a   :  { %v776_v17 = vpop.xlane.xlu1 %775 }
 0x39b   :  { %2210 = vrcp.f32 %v776_v17 }
 0x39e   :  { %v941_v18 = vpop.xlane.xlu0 %940  ;;  %v945_v24 = vpop.permute.xlu1 %944 }
 0x39f   :  { %2212 = vrcp.f32 %v941_v18 }
 0x3a1   :  { %v2209_v19 = vpop.eup %2208 }
 0x3a2   :  { %v612_v20 = vmul.f32 %v2209_v19, %v2201_v5  ;;  %v780_v21 = vpop.permute.xlu0 %779 }
 0x3a4   :  { %2035 = vmatmul.mubr.msk.f32.vlgmr.msra.gmra.mrb[8].mxu1 %vm439_vm3, %v612_v20 }
 0x3a5   :  { %v2211_v22 = vpop.eup %2210  ;;  %2043 = vmatpush3.msra.mxu1 %v780_v21  ;;  %2044 = vmatprep.mubr.msk.f32.mxu1 %vm2330_vm1, %v2329_v16 }
 0x3a6   :  { %v778_v23 = vmul.f32 %v2211_v22, %v2203_v7  ;;  %2052 = vmatprep.subr.mxu1 %v2329_v16 }
 0x3a8   :  { %2045 = vmatmul.mubr.msk.f32.vlgmr.msra.gmra.mrb[10].mxu1 %vm439_vm3, %v778_v23 }
 0x3a9   :  { %v2213_v25 = vpop.eup %2212  ;;  %2053 = vmatpush3.msra.mxu1 %v945_v24  ;;  %2054 = vmatprep.mubr.msk.f32.mxu1 %vm2330_vm1, %v2329_v16 }
 0x3aa   :  { %v943_v26 = vmul.f32 %v2213_v25, %v2205_v9  ;;  %2076 = vmatprep.subr.mxu1 %v2329_v16 }
 0x3ac   :  { %2055 = vmatmul.mubr.msk.f32.vlgmr.msra.gmra.mrb[12].mxu1 %vm439_vm3, %v943_v26 }
 0x3ad   :  { %2078 = vmatprep.mubr.msk.f32.mxu1 %vm2330_vm1, %v2329_v16 }
 0x3b0   :  { %2077 = vmatpush3.xpose.msk.msra.mxu1 %vm362_vm2, %v2499_v29 }
 0x3b1   :  { %2081 = vmatprep.subr.mxu1 %v2329_v16 }
 0x3b3   :  { %2079 = vmatmul.mubr.msk.f32.vlgmr.msra.gmra.mrb[14].mxu1 %vm362_vm2, %v2497_v27 }
 0x3b4   :  { %2082 = vmatpush3.msra.mxu1 %v2515_v34  ;;  %2083 = vmatprep.mubr.msk.f32.mxu1 %vm2330_vm1, %v2329_v16 }
 0x3b5   :  { %2086 = vmatprep.subr.mxu1 %v2329_v16 }
 0x40e   :  { %v520_v28 = vpop.f32.mrb[6].mxu1 }
 0x40f   :  { %v2026_v30 = vpop.f32.mrb[7].mxu1 }
 0x477   :  { %v686_v31 = vpop.f32.mrb[8].mxu1 }
 0x478   :  { %1021 = vrot.lane.b32.xlu0 %v686_v31, %s2334_s7  ;;  %v2036_v32 = vpop.f32.mrb[9].mxu1 }
 0x47b   :  { %v851_v33 = vpop.f32.mrb[10].mxu1 }
 0x47c   :  { %v2046_v35 = vpop.f32.mrb[11].mxu1 }
 0x47f   :  { %v1016_v36 = vpop.f32.mrb[12].mxu1 }
 0x480   :  { %v2056_v37 = vpop.f32.mrb[13].mxu1 }
 0x486   :  { %v1189_v38 = vpop.f32.mrb[14].mxu1 }
 0x487   :  { %v2080_v39 = vpop.f32.mrb[15].mxu1  ;;  %v1193_v40 = vsel %vm439_vm3, %v1189_v38, -inf }
 0x488   :  { %1194 = vmax.xlane.f32.xlu1 %v1193_v40 }
 0x499   :  { %1279 = vrot.lane.b32.xlu1 %v2499_v29, %s2332_s15 }
 0x49d   :  { %1025 = vrot.lane.b32.xlu1 %v851_v33, %s2335_s1 }
 0x4a1   :  { %1277 = vrot.lane.b32.xlu1 %v2497_v27, %s2332_s15 }
 0x4a5   :  { %1443 = vrot.lane.b32.xlu1 %v2497_v27, %s2331_s6 }
 0x4a9   :  { %1608 = vrot.lane.b32.xlu1 %v2497_v27, %s2333_s4  ;;  %v356_v27 = vld [vmem:[%s2709_s8 + $0x18] sm:$0xff] }
 0x4aa   :  { %v2163_v46 = vpack.c.bf16 %v356_v27, %v355_v43 }
 0x4ac   :  { %2164 = vmatpush3.bf16.msra.mxu0 %v2163_v46 }
 0x4ad   :  { %2165 = vmatprep.subr.bf16.mxu0 %v2336_v44 }
 0x4b0   :  { %2167 = vmatpush3.bf16.msra.mxu0 %v2166_v49 }
 0x4b1   :  { %2168 = vmatprep.subr.bf16.mxu0 %v2336_v44 }
 0x4b4   :  { %2170 = vmatpush3.bf16.msra.mxu0 %v2169_v52 }
 0x4b5   :  { %2096 = vmatprep.subr.mxu0 %v2329_v16 }
 0x4ea   :  { %v1022_v59 = vpop.permute.xlu0 %1021 }
 0x4eb   :  { %v1032_v62 = vsel %vm362_vm2, %v520_v28, %v1022_v59 }
 0x515   :  { %v1195_v53 = vpop.xlane.xlu1 %1194 }
 0x516   :  { %v1196_v54 = vsub.f32 %v1189_v38, %v1195_v53 }
 0x518   :  { %v1197_v55 = vmul.f32 1.442695, %v1196_v54 }
 0x519   :  { %v1280_v58 = vpop.permute.xlu1 %1279 }
 0x51a   :  { %2214 = vpow2.f32 %v1197_v55 }
 0x51d   :  { %v1026_v60 = vpop.permute.xlu1 %1025 }
 0x51e   :  { %v1033_v0 = vsel %vm94_vm0, %v1032_v62, %v1026_v60 }
 0x521   :  { %v1278_v63 = vpop.permute.xlu1 %1277 }
 0x524   :  { %v2215_v56 = vpop.eup %2214 }
 0x525   :  { %v1199_v57 = vsel %vm439_vm3, %v2215_v56, 0.0  ;;  %v1444_v3 = vpop.permute.xlu1 %1443 }
 0x526   :  { %1200 = vadd.xlane.f32.xlu0 %v1199_v57 }
 0x529   :  { %v1609_v7 = vpop.permute.xlu1 %1608 }
 0x53c   :  { %1029 = vrot.lane.b32.xlu0 %v1016_v36, %s2337_s11 }
 0x540   :  { %1445 = vrot.lane.b32.xlu0 %v2499_v29, %s2331_s6 }
 0x544   :  { %1610 = vrot.lane.b32.xlu0 %v2499_v29, %s2333_s4 }
 0x5b3   :  { %v1201_v61 = vpop.xlane.xlu0 %1200 }
 0x5b4   :  { %2216 = vrcp.f32 %v1201_v61 }
 0x5b7   :  { %v1030_v1 = vpop.permute.xlu0 %1029 }
 0x5b8   :  { %v1035_v2 = vsel %vm1034_vm4, %v1033_v0, %v1030_v1 }
 0x5b9   :  { %2074 = vmatmul.mubr.msk.f32.vlgmr.msra.gmra.mrb[8].mxu0 %vm1042_vm5, %v1035_v2 }
 0x5ba   :  { %2098 = vmatprep.mubr.msk.f32.mxu0 %vm2330_vm1, %v2329_v16 }
 0x5bb   :  { %v1446_v29 = vpop.permute.xlu0 %1445 }
 0x5bc   :  { %2097 = vmatpush3.xpose.msk.msra.mxu0 %vm362_vm2, %v1446_v29 }
 0x5bd   :  { %2106 = vmatprep.subr.mxu0 %v2329_v16 }
 0x5be   :  { %v2217_v4 = vpop.eup %2216 }
 0x5bf   :  { %v1203_v5 = vmul.f32 %v2217_v4, %v2215_v56  ;;  %v1611_v6 = vpop.permute.xlu0 %1610  ;;  %2099 = vmatmul.mubr.msk.f32.vlgmr.msra.gmra.mrb[10].mxu0 %vm362_vm2, %v1444_v3 }
 0x5c0   :  { %2107 = vmatpush3.xpose.msk.msra.mxu0 %vm362_vm2, %v1611_v6  ;;  %2108 = vmatprep.mubr.msk.f32.mxu0 %vm2330_vm1, %v2329_v16 }
 0x5c1   :  { %2084 = vmatmul.mubr.msk.f32.vlgmr.msra.gmra.mrb[16].mxu1 %vm439_vm3, %v1203_v5  ;;  %2171 = vmatprep.subr.bf16.mxu0 %v2336_v44 }
 0x5c2   :  { %2087 = vmatpush3.xpose.msk.msra.mxu1 %vm362_vm2, %v1280_v58  ;;  %2088 = vmatprep.mubr.msk.f32.mxu1 %vm2330_vm1, %v2329_v16 }
 0x5c3   :  { %2109 = vmatmul.mubr.msk.f32.vlgmr.msra.gmra.mrb[12].mxu0 %vm362_vm2, %v1609_v7  ;;  %2091 = vmatprep.subr.mxu1 %v2329_v16 }
 0x5c4   :  { %2173 = vmatpush3.bf16.msra.mxu0 %v2160_v45  ;;  %2132 = vmatprep.mubr.msk.f32.mxu0 %vm2330_vm1, %v2329_v16 }
 0x5c5   :  { %2089 = vmatmul.mubr.msk.f32.vlgmr.msra.gmra.mrb[18].mxu1 %vm362_vm2, %v1278_v63  ;;  %2174 = vmatprep.subr.bf16.mxu0 %v2336_v44 }
 0x5c6   :  { %2093 = vmatprep.mubr.msk.f32.mxu1 %vm2330_vm1, %v2329_v16 }
 0x5c8   :  { %2176 = vmatpush3.bf16.msra.mxu0 %v2163_v46 }
 0x5c9   :  { %2177 = vmatprep.subr.bf16.mxu0 %v2336_v44 }
 0x5cc   :  { %2179 = vmatpush3.bf16.msra.mxu0 %v2166_v49 }
 0x5cd   :  { %2180 = vmatprep.subr.bf16.mxu0 %v2336_v44 }
 0x5d0   :  { %2182 = vmatpush3.bf16.msra.mxu0 %v2169_v52 }
 0x68c   :  { %v1112_v9 = vpop.f32.mrb[8].mxu0 }
 0x68d   :  { %v1113_v10 = vadd.f32 %v2649_v8, %v1112_v9  ;;  %v2075_v11 = vpop.f32.mrb[9].mxu0 }
 0x68f   :  { %1116 = vst.msk [vmem:[#allocation8] sm:$0xff] %vm94_vm0, %v1113_v10 }
 0x692   :  { %v1517_v12 = vpop.f32.mrb[10].mxu0 }
 0x693   :  { %v2100_v13 = vpop.f32.mrb[11].mxu0  ;;  %v1521_v14 = vsel %vm439_vm3, %v1517_v12, -inf }
 0x694   :  { %1522 = vmax.xlane.f32.xlu1 %v1521_v14  ;;  %v2654_v15 = vpop.f32.mrb[16].mxu1 }
 0x695   :  { %v2085_v17 = vpop.f32.mrb[17].mxu1 }
 0x696   :  { %v1682_v18 = vpop.f32.mrb[12].mxu0 }
 0x697   :  { %v2110_v19 = vpop.f32.mrb[13].mxu0  ;;  %v1686_v23 = vsel %vm439_vm3, %v1682_v18, -inf }
 0x698   :  { %v1351_v20 = vpop.f32.mrb[18].mxu1 }
 0x699   :  { %v2090_v21 = vpop.f32.mrb[19].mxu1  ;;  %v1355_v22 = vsel %vm439_vm3, %v1351_v20, -inf }
 0x69a   :  { %1356 = vmax.xlane.f32.xlu0 %v1355_v22 }
 0x69e   :  { %1687 = vmax.xlane.f32.xlu0 %v1686_v23 }
 0x721   :  { %v1523_v24 = vpop.xlane.xlu1 %1522 }
 0x722   :  { %v1524_v25 = vsub.f32 %v1517_v12, %v1523_v24 }
 0x724   :  { %v1525_v26 = vmul.f32 1.442695, %v1524_v25 }
 0x726   :  { %2218 = vpow2.f32 %v1525_v26 }
 0x727   :  { %v1357_v28 = vpop.xlane.xlu0 %1356 }
 0x728   :  { %v1358_v30 = vsub.f32 %v1351_v20, %v1357_v28 }
 0x72a   :  { %v1359_v33 = vmul.f32 1.442695, %v1358_v30 }
 0x72b   :  { %v1688_v31 = vpop.xlane.xlu0 %1687 }
 0x72c   :  { %v1689_v32 = vsub.f32 %v1682_v18, %v1688_v31 }
 0x72e   :  { %v1690_v35 = vmul.f32 1.442695, %v1689_v32 }
 0x730   :  { %v2219_v36 = vpop.eup %2218  ;;  %2220 = vpow2.f32 %v1690_v35 }
 0x731   :  { %v1527_v37 = vsel %vm439_vm3, %v2219_v36, 0.0  ;;  %2222 = vpow2.f32 %v1359_v33 }
 0x732   :  { %1528 = vadd.xlane.f32.xlu1 %v1527_v37 }
 0x73a   :  { %v2221_v38 = vpop.eup %2220 }
 0x73b   :  { %v1692_v39 = vsel %vm439_vm3, %v2221_v38, 0.0  ;;  %v2223_v40 = vpop.eup %2222 }
 0x73c   :  { %1693 = vadd.xlane.f32.xlu0 %v1692_v39  ;;  %v1361_v41 = vsel %vm439_vm3, %v2223_v40, 0.0 }
 0x740   :  { %1362 = vadd.xlane.f32.xlu0 %v1361_v41 }
 0x743   :  { %1367 = vrot.lane.b32.xlu1 %v2515_v34, %s2332_s15 }
 0x747   :  { %1697 = vrot.lane.b32.xlu1 %v2515_v34, %s2333_s4 }
 0x756   :  { %1532 = vrot.lane.b32.xlu0 %v2515_v34, %s2331_s6  ;;  %s2296_s6 = scalar_lea.vmem %s1869_s13, 256 }
 0x757   :  { %p2297_p10 = scmp.ne.s32.totalorder %s1869_s13, %s2296_s6  ;;  %p2302_p12 = scmp.lt.s32.totalorder %s2296_s6, %s2296_s6 }
 0x759   :  { %p2303_p13 = por %p2302_p12, %p2301_p11 }
 0x75b   :  { %p2304_p0 = pnand %p2303_p13, %p2297_p10 }
 0x7bf   :  { %v1529_v42 = vpop.xlane.xlu1 %1528 }
 0x7c3   :  { %v1368_v43 = vpop.permute.xlu1 %1367 }
 0x7c4   :  { %2092 = vmatpush3.msra.mxu1 %v1368_v43 }
 0x7c5   :  { %2101 = vmatprep.subr.mxu1 %v2329_v16 }
 0x7c7   :  { %v1698_v50 = vpop.permute.xlu1 %1697 }
 0x7c9   :  { %v1694_v44 = vpop.xlane.xlu0 %1693 }
 0x7cd   :  { %v1363_v45 = vpop.xlane.xlu0 %1362 }
 0x7ce   :  { %2224 = vrcp.f32 %v1363_v45 }
 0x7cf   :  { %2226 = vrcp.f32 %v1529_v42 }
 0x7d0   :  { %2228 = vrcp.f32 %v1694_v44 }
 0x7d1   :  { %v1533_v48 = vpop.permute.xlu0 %1532 }
 0x7d8   :  { %v2225_v27 = vpop.eup %2224 }
 0x7d9   :  { %v1365_v46 = vmul.f32 %v2225_v27, %v2223_v40  ;;  %v2227_v47 = vpop.eup %2226 }
 0x7da   :  { %v1531_v34 = vmul.f32 %v2227_v47, %v2219_v36  ;;  %v2229_v49 = vpop.eup %2228 }
 0x7db   :  { %2094 = vmatmul.mubr.msk.f32.vlgmr.msra.gmra.mrb[20].mxu1 %vm439_vm3, %v1365_v46  ;;  %v1696_v51 = vmul.f32 %v2229_v49, %v2221_v38 }
 0x7dc   :  { %2102 = vmatpush3.msra.mxu1 %v1533_v48  ;;  %2103 = vmatprep.mubr.msk.f32.mxu1 %vm2330_vm1, %v2329_v16 }
 0x7dd   :  { %2111 = vmatprep.subr.mxu1 %v2329_v16 }
 0x7df   :  { %2104 = vmatmul.mubr.msk.f32.vlgmr.msra.gmra.mrb[22].mxu1 %vm439_vm3, %v1531_v34 }
 0x7e0   :  { %2112 = vmatpush3.msra.mxu1 %v1698_v50  ;;  %2113 = vmatprep.mubr.msk.f32.mxu1 %vm2330_vm1, %v2329_v16 }
 0x7e3   :  { %2114 = vmatmul.mubr.msk.f32.vlgmr.msra.gmra.mrb[24].mxu1 %vm439_vm3, %v1696_v51 }
 0x8ae   :  { %v1439_v52 = vpop.f32.mrb[20].mxu1 }
 0x8af   :  { %1774 = vrot.lane.b32.xlu1 %v1439_v52, %s2334_s7  ;;  %v2095_v53 = vpop.f32.mrb[21].mxu1 }
 0x8b2   :  { %v1604_v54 = vpop.f32.mrb[22].mxu1 }
 0x8b3   :  { %1778 = vrot.lane.b32.xlu0 %v1604_v54, %s2335_s1  ;;  %v2105_v55 = vpop.f32.mrb[23].mxu1 }
 0x8b6   :  { %v1769_v56 = vpop.f32.mrb[24].mxu1 }
 0x8b7   :  { %1782 = vrot.lane.b32.xlu1 %v1769_v56, %s2337_s11  ;;  %v2115_v57 = vpop.f32.mrb[25].mxu1 }
 0x921   :  { %v1775_v58 = vpop.permute.xlu1 %1774 }
 0x922   :  { %v1785_v16 = vsel %vm362_vm2, %v2654_v15, %v1775_v58 }
 0x925   :  { %v1779_v59 = vpop.permute.xlu0 %1778 }
 0x926   :  { %v1786_v60 = vsel %vm94_vm0, %v1785_v16, %v1779_v59 }
 0x929   :  { %v1783_v61 = vpop.permute.xlu1 %1782 }
 0x92a   :  { %v1787_v62 = vsel %vm1034_vm4, %v1786_v60, %v1783_v61 }
 0x92b   :  { %2133 = vmatmul.mubr.msk.f32.vlgmr.msra.gmra.mrb[14].mxu0 %vm1042_vm5, %v1787_v62 }
 0x9fe   :  { %v1857_v63 = vpop.f32.mrb[14].mxu0 }
 0x9ff   :  { %v1858_v0 = vadd.f32 %v2649_v8, %v1857_v63  ;;  %v2134_v1 = vpop.f32.mrb[15].mxu0 }
 0xa01   :  { %1862 = vst.msk [vmem:[#allocation8 + $0x8] sm:$0xff] %vm94_vm0, %v1858_v0 }
 0xa02   :  { %2307 = shalt.err (!%p2304_p0)
}
 0xa03   :  { %s2308_s17 = scalar_lea.hbm %s2711_s10, 256 }
 0xa04   :  { %p2309_p1 = scmp.ne.s32.totalorder %s2711_s10, %s2308_s17  ;;  %p2312_p2 = scmp.lt.u32.totalorder %s2308_s17, %s2711_s10 }
 0xa06   :  { %p2314_p3 = pnand %p2312_p2, %p2309_p1 }
 0xa08   :  { %2317 = shalt.err (!%p2314_p3)
}
 0xa09   :  { %1874 = dma.vmem_to_hbm [thread:$0]  %s1869_s13, 256, %s2711_s10, [#allocation4], %s2326_s25, %s2326_s25, %s2327_s26  }
 0xa0a   :  { %2322 = dma.done.wait [#allocation4], 256  }
 0xa0b   :  { %2323 = vsyncadd [#allocation4], 4294967040 }
 0xa0c   :  { %1878 = vsyncpa [#allocation3], 1 }
 0xa0d   :  { %1879 = vsyncpa [#allocation6], 1 }
 0xa0e   :  { %1880 = vsyncpa [#allocation4], 1 }

</bundles_post_ra>
